<compile_context>
chip_gen: v5e
topology: v5e:2x2
jax: 0.10.0
libtpu: 0.0.40
codegen_flags: <defaults>
</compile_context>

<pallas_src>
import math

import jax
import jax.numpy as jnp
from jax.experimental import pallas as pl
from jax.experimental.pallas import tpu as pltpu

# Problem sizes (small, consistent with the module's constructor)
B, S, E, H = 2, 8, 32, 4          # batch, seq, embed_dim, num_heads
DH = E // H                       # head dim
FF = 4 * E                        # ff_expansion_factor = 4
BS = B * S                        # rows in the fused slab
G = B * H                         # merged (batch, head) group axis
EPS = 1e-5                        # nn.LayerNorm default eps


def transformer_block_kernel(x_ref,
                             ln1_g, ln1_b,
                             wq_g, bq_g, wk_g, bk_g, wv_g, bv_g,
                             wo_g, bo,
                             ln2_g, ln2_b,
                             w1, b1, w2, b2,
                             out_ref):
    # Whole batch processed as one [B*S, E] slab, single kernel invocation.
    x = x_ref[...]                                       # [BS, E] f32

    # ---------------- LayerNorm 1 ----------------
    mu = jnp.mean(x, axis=-1, keepdims=True)
    var = jnp.mean(jnp.square(x - mu), axis=-1, keepdims=True)
    xn = (x - mu) * jax.lax.rsqrt(var + EPS) * ln1_g[...] + ln1_b[...]

    # ---------------- Multi-head self-attention (heads merged) -------------
    # Replicate the normalized rows across the head axis: [G, S, E] with
    # group order g = b*H + h.  Leading-dim reshape + vreg-group broadcast
    # only (no lane relayouts).
    xn_g = jnp.broadcast_to(xn.reshape(B, 1, S, E), (B, H, S, E)).reshape(G, S, E)

    # Head-major Q/K/V projections as single batched einsums; the attention
    # scale 1/sqrt(DH) is already folded into wq_g / bq_g host-side.
    q = jnp.einsum('gse,ged->gsd', xn_g, wq_g[...],
                   preferred_element_type=jnp.float32) + bq_g[...]   # [G,S,DH]
    k = jnp.einsum('gse,ged->gsd', xn_g, wk_g[...],
                   preferred_element_type=jnp.float32) + bk_g[...]
    v = jnp.einsum('gse,ged->gsd', xn_g, wv_g[...],
                   preferred_element_type=jnp.float32) + bv_g[...]

    # One scores einsum + one softmax + one context einsum for all (b, h).
    s = jnp.einsum('gqd,gkd->gqk', q, k,
                   preferred_element_type=jnp.float32)               # [G,S,S]
    s = s - jnp.max(s, axis=-1, keepdims=True)
    p = jnp.exp(s)
    p = p * pl.reciprocal(jnp.sum(p, axis=-1, keepdims=True), approx=True)
    ctx = jnp.einsum('gqk,gkd->gqd', p, v,
                     preferred_element_type=jnp.float32)             # [G,S,DH]

    # Output projection: per-group contraction against host-prepared W_o head
    # slices [G, DH, E], then reduce over heads (plain VALU adds of H slabs).
    proj = jnp.einsum('gsd,gde->gse', ctx, wo_g[...],
                      preferred_element_type=jnp.float32)            # [G,S,E]
    attn = jnp.sum(proj.reshape(B, H, S, E), axis=1).reshape(BS, E)  # [BS,E]

    x1 = attn + bo[...] + x                              # residual 1

    # ---------------- LayerNorm 2 ----------------
    mu2 = jnp.mean(x1, axis=-1, keepdims=True)
    var2 = jnp.mean(jnp.square(x1 - mu2), axis=-1, keepdims=True)
    xn2 = (x1 - mu2) * jax.lax.rsqrt(var2 + EPS) * ln2_g[...] + ln2_b[...]

    # ---------------- FeedForward ----------------
    # TODO(synk): dropout omitted (eval mode / deterministic forward).
    h1 = jnp.dot(xn2, w1[...], preferred_element_type=jnp.float32) + b1[...]
    h1 = jnp.maximum(h1, 0.0)                            # ReLU
    ff = jnp.dot(h1, w2[...], preferred_element_type=jnp.float32) + b2[...]

    out_ref[...] = (ff + x1).astype(out_ref.dtype)       # residual 2


def init_params(key):
    """PyTorch-equivalent parameters (nn.Linear / nn.LayerNorm defaults)."""
    def lin(k, fan_in, fan_out):
        bound = 1.0 / math.sqrt(fan_in)
        kw, kb = jax.random.split(k)
        w = jax.random.uniform(kw, (fan_in, fan_out), jnp.float32, -bound, bound)
        b = jax.random.uniform(kb, (1, fan_out), jnp.float32, -bound, bound)
        return w, b

    ks = jax.random.split(key, 6)
    wq, bq = lin(ks[0], E, E)
    wk, bk = lin(ks[1], E, E)
    wv, bv = lin(ks[2], E, E)
    wo, bo = lin(ks[3], E, E)
    w1, b1 = lin(ks[4], E, FF)
    w2, b2 = lin(ks[5], FF, E)
    ln1_g, ln1_b = jnp.ones((1, E), jnp.float32), jnp.zeros((1, E), jnp.float32)
    ln2_g, ln2_b = jnp.ones((1, E), jnp.float32), jnp.zeros((1, E), jnp.float32)
    return (ln1_g, ln1_b, wq, bq, wk, bk, wv, bv, wo, bo,
            ln2_g, ln2_b, w1, b1, w2, b2)


def prepare_params(params):
    """One-time host-side weight rearrangement (hoisted out of the forward):
      * Q/K/V weights -> head-major batched tensors [G, E, DH] (tiled over B),
        biases -> [G, 1, DH];  attention scale folded into the Q weights/bias.
      * W_o -> per-head row slices [G, DH, E].
    """
    (ln1_g, ln1_b, wq, bq, wk, bk, wv, bv, wo, bo,
     ln2_g, ln2_b, w1, b1, w2, b2) = params

    scale = 1.0 / math.sqrt(DH)

    def per_head_w(w):                                    # [E, E] -> [G, E, DH]
        wh = w.reshape(E, H, DH).transpose(1, 0, 2)       # [H, E, DH]
        return jnp.broadcast_to(wh[None], (B, H, E, DH)).reshape(G, E, DH)

    def per_head_b(b):                                    # [1, E] -> [G, 1, DH]
        bh = b.reshape(1, H, 1, DH)
        return jnp.broadcast_to(bh, (B, H, 1, DH)).reshape(G, 1, DH)

    wq_g, bq_g = per_head_w(wq * scale), per_head_b(bq * scale)
    wk_g, bk_g = per_head_w(wk), per_head_b(bk)
    wv_g, bv_g = per_head_w(wv), per_head_b(bv)

    woh = wo.reshape(H, DH, E)                            # rows grouped per head
    wo_g = jnp.broadcast_to(woh[None], (B, H, DH, E)).reshape(G, DH, E)

    return (ln1_g, ln1_b, wq_g, bq_g, wk_g, bk_g, wv_g, bv_g, wo_g, bo,
            ln2_g, ln2_b, w1, b1, w2, b2)


@jax.jit
def transformer_block(x, kparams):
    x2d = x.reshape(BS, E)                                # single [B*S, E] slab

    vmem_spec = pl.BlockSpec(memory_space=pltpu.MemorySpace.VMEM)
    n_in = 1 + len(kparams)

    out2d = pl.pallas_call(
        transformer_block_kernel,
        out_shape=jax.ShapeDtypeStruct((BS, E), jnp.float32),
        in_specs=[vmem_spec] * n_in,                      # grid-less: whole arrays in VMEM
        out_specs=vmem_spec,
    )(x2d, *kparams)
    return out2d.reshape(B, S, E)


def transformer_block_ref(x, params):
    (ln1_g, ln1_b, wq, bq, wk, bk, wv, bv, wo, bo,
     ln2_g, ln2_b, w1, b1, w2, b2) = params

    def layernorm(z, g, b):
        mu = jnp.mean(z, axis=-1, keepdims=True)
        var = jnp.mean(jnp.square(z - mu), axis=-1, keepdims=True)
        return (z - mu) * jax.lax.rsqrt(var + EPS) * g + b

    xn = layernorm(x, ln1_g, ln1_b)
    q = xn @ wq + bq
    k = xn @ wk + bk
    v = xn @ wv + bv
    q = q.reshape(B, S, H, DH).transpose(0, 2, 1, 3)
    k = k.reshape(B, S, H, DH).transpose(0, 2, 1, 3)
    v = v.reshape(B, S, H, DH).transpose(0, 2, 1, 3)
    s = jnp.einsum("bhqd,bhkd->bhqk", q, k) / math.sqrt(DH)
    p = jax.nn.softmax(s, axis=-1)
    ctx = jnp.einsum("bhqk,bhkd->bhqd", p, v).transpose(0, 2, 1, 3).reshape(B, S, E)
    x1 = ctx @ wo + bo + x
    xn2 = layernorm(x1, ln2_g, ln2_b)
    ff = jnp.maximum(xn2 @ w1 + b1, 0.0) @ w2 + b2
    return ff + x1


if __name__ == "__main__":
    key = jax.random.PRNGKey(0)
    kx, kp = jax.random.split(key)
    x = jax.random.normal(kx, (B, S, E), jnp.float32)
    params = init_params(kp)
    kparams = prepare_params(params)                      # one-time host-side prep

    out = transformer_block(x, kparams)
    out = jax.block_until_ready(out)

    ref = transformer_block_ref(x, params)
    assert out.shape == (B, S, E)
    max_err = float(jnp.max(jnp.abs(out - ref)))
    # Tolerance 2e-3: covers the ~2^-12 relative error of the EUP approximate
    # reciprocal used for the softmax denominator (error stays relative through
    # the output projection / residuals, so margin is ~4x).
    assert jnp.allclose(out, ref, rtol=2e-3, atol=2e-3), (
        f"mismatch vs JAX reference (max abs err {max_err})")

    print("KERNEL_OK")
</pallas_src>

<mosaic_0001>
module attributes {stable_mosaic.version = 11 : i64} {
  func.func @transformer_block_kernel(%arg0: memref<16x32xf32, #tpu.memory_space<vmem>>, %arg1: memref<1x32xf32, #tpu.memory_space<vmem>>, %arg2: memref<1x32xf32, #tpu.memory_space<vmem>>, %arg3: memref<8x32x8xf32, #tpu.memory_space<vmem>>, %arg4: memref<8x1x8xf32, #tpu.memory_space<vmem>>, %arg5: memref<8x32x8xf32, #tpu.memory_space<vmem>>, %arg6: memref<8x1x8xf32, #tpu.memory_space<vmem>>, %arg7: memref<8x32x8xf32, #tpu.memory_space<vmem>>, %arg8: memref<8x1x8xf32, #tpu.memory_space<vmem>>, %arg9: memref<8x8x32xf32, #tpu.memory_space<vmem>>, %arg10: memref<1x32xf32, #tpu.memory_space<vmem>>, %arg11: memref<1x32xf32, #tpu.memory_space<vmem>>, %arg12: memref<1x32xf32, #tpu.memory_space<vmem>>, %arg13: memref<32x128xf32, #tpu.memory_space<vmem>>, %arg14: memref<1x128xf32, #tpu.memory_space<vmem>>, %arg15: memref<128x32xf32, #tpu.memory_space<vmem>>, %arg16: memref<1x32xf32, #tpu.memory_space<vmem>>, %arg17: memref<16x32xf32, #tpu.memory_space<vmem>>) attributes {dimension_semantics = [], scalar_prefetch = 0 : i64, scratch_operands = 0 : i64, tpu.core_type = #tpu.core_type<tc>} {
    %c0 = arith.constant 0 : index
    %c0_0 = arith.constant 0 : index
    %0 = vector.load %arg0[%c0, %c0_0] : memref<16x32xf32, #tpu.memory_space<vmem>>, vector<16x32xf32>
    %cst = arith.constant dense<0.000000e+00> : vector<16xf32>
    %1 = vector.multi_reduction <add>, %0, %cst [1] : vector<16x32xf32> to vector<16xf32>
    %2 = vector.shape_cast %1 : vector<16xf32> to vector<16x1xf32>
    %cst_1 = arith.constant 3.200000e+01 : f32
    %3 = vector.broadcast %cst_1 : f32 to vector<16x1xf32>
    %4 = arith.divf %2, %3 : vector<16x1xf32>
    %5 = vector.broadcast %4 : vector<16x1xf32> to vector<16x32xf32>
    %6 = arith.subf %0, %5 : vector<16x32xf32>
    %7 = arith.mulf %6, %6 : vector<16x32xf32>
    %cst_2 = arith.constant dense<0.000000e+00> : vector<16xf32>
    %8 = vector.multi_reduction <add>, %7, %cst_2 [1] : vector<16x32xf32> to vector<16xf32>
    %9 = vector.shape_cast %8 : vector<16xf32> to vector<16x1xf32>
    %cst_3 = arith.constant 3.200000e+01 : f32
    %10 = vector.broadcast %cst_3 : f32 to vector<16x1xf32>
    %11 = arith.divf %9, %10 : vector<16x1xf32>
    %12 = vector.broadcast %4 : vector<16x1xf32> to vector<16x32xf32>
    %13 = arith.subf %0, %12 : vector<16x32xf32>
    %cst_4 = arith.constant 9.99999974E-6 : f32
    %14 = vector.broadcast %cst_4 : f32 to vector<16x1xf32>
    %15 = arith.addf %11, %14 : vector<16x1xf32>
    %16 = math.rsqrt %15 : vector<16x1xf32>
    %17 = vector.broadcast %16 : vector<16x1xf32> to vector<16x32xf32>
    %18 = arith.mulf %13, %17 : vector<16x32xf32>
    %c0_5 = arith.constant 0 : index
    %c0_6 = arith.constant 0 : index
    %19 = vector.load %arg1[%c0_5, %c0_6] : memref<1x32xf32, #tpu.memory_space<vmem>>, vector<1x32xf32>
    %20 = vector.broadcast %19 : vector<1x32xf32> to vector<16x32xf32>
    %21 = arith.mulf %18, %20 : vector<16x32xf32>
    %c0_7 = arith.constant 0 : index
    %c0_8 = arith.constant 0 : index
    %22 = vector.load %arg2[%c0_7, %c0_8] : memref<1x32xf32, #tpu.memory_space<vmem>>, vector<1x32xf32>
    %23 = vector.broadcast %22 : vector<1x32xf32> to vector<16x32xf32>
    %24 = arith.addf %21, %23 : vector<16x32xf32>
    %25 = vector.shape_cast %24 : vector<16x32xf32> to vector<2x1x8x32xf32>
    %26 = vector.shape_cast %25 : vector<2x1x8x32xf32> to vector<2x1x8x32xf32>
    %27 = vector.broadcast %26 : vector<2x1x8x32xf32> to vector<2x4x8x32xf32>
    %28 = vector.shape_cast %27 : vector<2x4x8x32xf32> to vector<8x8x32xf32>
    %c0_9 = arith.constant 0 : index
    %c0_10 = arith.constant 0 : index
    %c0_11 = arith.constant 0 : index
    %29 = vector.load %arg3[%c0_9, %c0_10, %c0_11] : memref<8x32x8xf32, #tpu.memory_space<vmem>>, vector<8x32x8xf32>
    "tpu.trace_start"() <{level = 10 : i32, message = "gse,ged->gsd"}> : () -> ()
    %cst_12 = arith.constant dense<0.000000e+00> : vector<8x8x8xf32>
    %30 = tpu.matmul %28, %29, %cst_12 {dimension_numbers = #tpu.dot_dimension_numbers<[2], [1], [1], [2], [0, 0, 0, 1, 1, 2], [0], [0]>} : vector<8x8x32xf32>, vector<8x32x8xf32>, vector<8x8x8xf32> -> vector<8x8x8xf32>
    "tpu.trace_stop"() : () -> ()
    %c0_13 = arith.constant 0 : index
    %c0_14 = arith.constant 0 : index
    %c0_15 = arith.constant 0 : index
    %31 = vector.load %arg4[%c0_13, %c0_14, %c0_15] : memref<8x1x8xf32, #tpu.memory_space<vmem>>, vector<8x1x8xf32>
    %32 = vector.broadcast %31 : vector<8x1x8xf32> to vector<8x8x8xf32>
    %33 = arith.addf %30, %32 : vector<8x8x8xf32>
    %c0_16 = arith.constant 0 : index
    %c0_17 = arith.constant 0 : index
    %c0_18 = arith.constant 0 : index
    %34 = vector.load %arg5[%c0_16, %c0_17, %c0_18] : memref<8x32x8xf32, #tpu.memory_space<vmem>>, vector<8x32x8xf32>
    "tpu.trace_start"() <{level = 10 : i32, message = "gse,ged->gsd"}> : () -> ()
    %cst_19 = arith.constant dense<0.000000e+00> : vector<8x8x8xf32>
    %35 = tpu.matmul %28, %34, %cst_19 {dimension_numbers = #tpu.dot_dimension_numbers<[2], [1], [1], [2], [0, 0, 0, 1, 1, 2], [0], [0]>} : vector<8x8x32xf32>, vector<8x32x8xf32>, vector<8x8x8xf32> -> vector<8x8x8xf32>
    "tpu.trace_stop"() : () -> ()
    %c0_20 = arith.constant 0 : index
    %c0_21 = arith.constant 0 : index
    %c0_22 = arith.constant 0 : index
    %36 = vector.load %arg6[%c0_20, %c0_21, %c0_22] : memref<8x1x8xf32, #tpu.memory_space<vmem>>, vector<8x1x8xf32>
    %37 = vector.broadcast %36 : vector<8x1x8xf32> to vector<8x8x8xf32>
    %38 = arith.addf %35, %37 : vector<8x8x8xf32>
    %c0_23 = arith.constant 0 : index
    %c0_24 = arith.constant 0 : index
    %c0_25 = arith.constant 0 : index
    %39 = vector.load %arg7[%c0_23, %c0_24, %c0_25] : memref<8x32x8xf32, #tpu.memory_space<vmem>>, vector<8x32x8xf32>
    "tpu.trace_start"() <{level = 10 : i32, message = "gse,ged->gsd"}> : () -> ()
    %cst_26 = arith.constant dense<0.000000e+00> : vector<8x8x8xf32>
    %40 = tpu.matmul %28, %39, %cst_26 {dimension_numbers = #tpu.dot_dimension_numbers<[2], [1], [1], [2], [0, 0, 0, 1, 1, 2], [0], [0]>} : vector<8x8x32xf32>, vector<8x32x8xf32>, vector<8x8x8xf32> -> vector<8x8x8xf32>
    "tpu.trace_stop"() : () -> ()
    %c0_27 = arith.constant 0 : index
    %c0_28 = arith.constant 0 : index
    %c0_29 = arith.constant 0 : index
    %41 = vector.load %arg8[%c0_27, %c0_28, %c0_29] : memref<8x1x8xf32, #tpu.memory_space<vmem>>, vector<8x1x8xf32>
    %42 = vector.broadcast %41 : vector<8x1x8xf32> to vector<8x8x8xf32>
    %43 = arith.addf %40, %42 : vector<8x8x8xf32>
    "tpu.trace_start"() <{level = 10 : i32, message = "gqd,gkd->gqk"}> : () -> ()
    %cst_30 = arith.constant dense<0.000000e+00> : vector<8x8x8xf32>
    %44 = tpu.matmul %33, %38, %cst_30 {dimension_numbers = #tpu.dot_dimension_numbers<[2], [2], [1], [1], [0, 0, 0, 1, 1, 1], [0], [0]>} : vector<8x8x8xf32>, vector<8x8x8xf32>, vector<8x8x8xf32> -> vector<8x8x8xf32>
    "tpu.trace_stop"() : () -> ()
    %cst_31 = arith.constant dense<0xFF800000> : vector<8x8xf32>
    %45 = vector.multi_reduction <maximumf>, %44, %cst_31 [2] : vector<8x8x8xf32> to vector<8x8xf32>
    %46 = vector.shape_cast %45 : vector<8x8xf32> to vector<8x8x1xf32>
    %47 = vector.broadcast %46 : vector<8x8x1xf32> to vector<8x8x8xf32>
    %48 = arith.subf %44, %47 : vector<8x8x8xf32>
    %49 = math.exp %48 : vector<8x8x8xf32>
    %cst_32 = arith.constant dense<0.000000e+00> : vector<8x8xf32>
    %50 = vector.multi_reduction <add>, %49, %cst_32 [2] : vector<8x8x8xf32> to vector<8x8xf32>
    %51 = vector.shape_cast %50 : vector<8x8xf32> to vector<8x8x1xf32>
    %52 = tpu.reciprocal %51 {approx = true} : vector<8x8x1xf32> -> vector<8x8x1xf32>
    %53 = vector.broadcast %52 : vector<8x8x1xf32> to vector<8x8x8xf32>
    %54 = arith.mulf %49, %53 : vector<8x8x8xf32>
    "tpu.trace_start"() <{level = 10 : i32, message = "gqk,gkd->gqd"}> : () -> ()
    %cst_33 = arith.constant dense<0.000000e+00> : vector<8x8x8xf32>
    %55 = tpu.matmul %54, %43, %cst_33 {dimension_numbers = #tpu.dot_dimension_numbers<[2], [1], [1], [2], [0, 0, 0, 1, 1, 2], [0], [0]>} : vector<8x8x8xf32>, vector<8x8x8xf32>, vector<8x8x8xf32> -> vector<8x8x8xf32>
    "tpu.trace_stop"() : () -> ()
    %c0_34 = arith.constant 0 : index
    %c0_35 = arith.constant 0 : index
    %c0_36 = arith.constant 0 : index
    %56 = vector.load %arg9[%c0_34, %c0_35, %c0_36] : memref<8x8x32xf32, #tpu.memory_space<vmem>>, vector<8x8x32xf32>
    "tpu.trace_start"() <{level = 10 : i32, message = "gsd,gde->gse"}> : () -> ()
    %cst_37 = arith.constant dense<0.000000e+00> : vector<8x8x32xf32>
    %57 = tpu.matmul %55, %56, %cst_37 {dimension_numbers = #tpu.dot_dimension_numbers<[2], [1], [1], [2], [0, 0, 0, 1, 1, 2], [0], [0]>} : vector<8x8x8xf32>, vector<8x8x32xf32>, vector<8x8x32xf32> -> vector<8x8x32xf32>
    "tpu.trace_stop"() : () -> ()
    %58 = vector.shape_cast %57 : vector<8x8x32xf32> to vector<2x4x8x32xf32>
    %cst_38 = arith.constant dense<0.000000e+00> : vector<2x8x32xf32>
    %59 = vector.multi_reduction <add>, %58, %cst_38 [1] : vector<2x4x8x32xf32> to vector<2x8x32xf32>
    %60 = vector.shape_cast %59 : vector<2x8x32xf32> to vector<16x32xf32>
    %c0_39 = arith.constant 0 : index
    %c0_40 = arith.constant 0 : index
    %61 = vector.load %arg10[%c0_39, %c0_40] : memref<1x32xf32, #tpu.memory_space<vmem>>, vector<1x32xf32>
    %62 = vector.broadcast %61 : vector<1x32xf32> to vector<16x32xf32>
    %63 = arith.addf %60, %62 : vector<16x32xf32>
    %64 = arith.addf %63, %0 : vector<16x32xf32>
    %cst_41 = arith.constant dense<0.000000e+00> : vector<16xf32>
    %65 = vector.multi_reduction <add>, %64, %cst_41 [1] : vector<16x32xf32> to vector<16xf32>
    %66 = vector.shape_cast %65 : vector<16xf32> to vector<16x1xf32>
    %cst_42 = arith.constant 3.200000e+01 : f32
    %67 = vector.broadcast %cst_42 : f32 to vector<16x1xf32>
    %68 = arith.divf %66, %67 : vector<16x1xf32>
    %69 = vector.broadcast %68 : vector<16x1xf32> to vector<16x32xf32>
    %70 = arith.subf %64, %69 : vector<16x32xf32>
    %71 = arith.mulf %70, %70 : vector<16x32xf32>
    %cst_43 = arith.constant dense<0.000000e+00> : vector<16xf32>
    %72 = vector.multi_reduction <add>, %71, %cst_43 [1] : vector<16x32xf32> to vector<16xf32>
    %73 = vector.shape_cast %72 : vector<16xf32> to vector<16x1xf32>
    %cst_44 = arith.constant 3.200000e+01 : f32
    %74 = vector.broadcast %cst_44 : f32 to vector<16x1xf32>
    %75 = arith.divf %73, %74 : vector<16x1xf32>
    %76 = vector.broadcast %68 : vector<16x1xf32> to vector<16x32xf32>
    %77 = arith.subf %64, %76 : vector<16x32xf32>
    %cst_45 = arith.constant 9.99999974E-6 : f32
    %78 = vector.broadcast %cst_45 : f32 to vector<16x1xf32>
    %79 = arith.addf %75, %78 : vector<16x1xf32>
    %80 = math.rsqrt %79 : vector<16x1xf32>
    %81 = vector.broadcast %80 : vector<16x1xf32> to vector<16x32xf32>
    %82 = arith.mulf %77, %81 : vector<16x32xf32>
    %c0_46 = arith.constant 0 : index
    %c0_47 = arith.constant 0 : index
    %83 = vector.load %arg11[%c0_46, %c0_47] : memref<1x32xf32, #tpu.memory_space<vmem>>, vector<1x32xf32>
    %84 = vector.broadcast %83 : vector<1x32xf32> to vector<16x32xf32>
    %85 = arith.mulf %82, %84 : vector<16x32xf32>
    %c0_48 = arith.constant 0 : index
    %c0_49 = arith.constant 0 : index
    %86 = vector.load %arg12[%c0_48, %c0_49] : memref<1x32xf32, #tpu.memory_space<vmem>>, vector<1x32xf32>
    %87 = vector.broadcast %86 : vector<1x32xf32> to vector<16x32xf32>
    %88 = arith.addf %85, %87 : vector<16x32xf32>
    %c0_50 = arith.constant 0 : index
    %c0_51 = arith.constant 0 : index
    %89 = vector.load %arg13[%c0_50, %c0_51] : memref<32x128xf32, #tpu.memory_space<vmem>>, vector<32x128xf32>
    %cst_52 = arith.constant dense<0.000000e+00> : vector<16x128xf32>
    %90 = tpu.matmul %88, %89, %cst_52 {dimension_numbers = #tpu.dot_dimension_numbers<[1], [0], [0], [1], [0, 0, 1, 1], [], []>} : vector<16x32xf32>, vector<32x128xf32>, vector<16x128xf32> -> vector<16x128xf32>
    %c0_53 = arith.constant 0 : index
    %c0_54 = arith.constant 0 : index
    %91 = vector.load %arg14[%c0_53, %c0_54] : memref<1x128xf32, #tpu.memory_space<vmem>>, vector<1x128xf32>
    %92 = vector.broadcast %91 : vector<1x128xf32> to vector<16x128xf32>
    %93 = arith.addf %90, %92 : vector<16x128xf32>
    %cst_55 = arith.constant 0.000000e+00 : f32
    %94 = vector.broadcast %cst_55 : f32 to vector<16x128xf32>
    %95 = arith.maximumf %93, %94 : vector<16x128xf32>
    %c0_56 = arith.constant 0 : index
    %c0_57 = arith.constant 0 : index
    %96 = vector.load %arg15[%c0_56, %c0_57] : memref<128x32xf32, #tpu.memory_space<vmem>>, vector<128x32xf32>
    %cst_58 = arith.constant dense<0.000000e+00> : vector<16x32xf32>
    %97 = tpu.matmul %95, %96, %cst_58 {dimension_numbers = #tpu.dot_dimension_numbers<[1], [0], [0], [1], [0, 0, 1, 1], [], []>} : vector<16x128xf32>, vector<128x32xf32>, vector<16x32xf32> -> vector<16x32xf32>
    %c0_59 = arith.constant 0 : index
    %c0_60 = arith.constant 0 : index
    %98 = vector.load %arg16[%c0_59, %c0_60] : memref<1x32xf32, #tpu.memory_space<vmem>>, vector<1x32xf32>
    %99 = vector.broadcast %98 : vector<1x32xf32> to vector<16x32xf32>
    %100 = arith.addf %97, %99 : vector<16x32xf32>
    %101 = arith.addf %100, %64 : vector<16x32xf32>
    %c0_61 = arith.constant 0 : index
    %c0_62 = arith.constant 0 : index
    %102 = vector.load %arg17[%c0_61, %c0_62] : memref<16x32xf32, #tpu.memory_space<vmem>>, vector<16x32xf32>
    tpu.vector_store %arg17[%c0_61, %c0_62], %101 {strides = array<i32>} : memref<16x32xf32, #tpu.memory_space<vmem>>, vector<16x32xf32>,
    return
  }
}

</mosaic_0001>

<bundles_post_ra>
// kernel: transformer_block.1
= control target key start
LH: loop header
LB: loop body
LE: loop exit
PB: predicated region body
PF: predicated region fallthrough
CT: control target
= control target key end

     0   :  { %s2551_s0 = inlined_call_operand.vmem [shape: f32[16,32], index: 0, kind: input, shape index: {}]   ;;  %s2552_s1 = inlined_call_operand.vmem [shape: f32[1,32], index: 1, kind: input, shape index: {}]   ;;  %s2553_s2 = inlined_call_operand.vmem [shape: f32[1,32], index: 2, kind: input, shape index: {}]   ;;  %s2554_s3 = inlined_call_operand.vmem [shape: f32[8,32,8], index: 3, kind: input, shape index: {}]   ;;  %s2555_s4 = inlined_call_operand.vmem [shape: f32[8,1,8], index: 4, kind: input, shape index: {}]   ;;  %s2556_s5 = inlined_call_operand.vmem [shape: f32[8,32,8], index: 5, kind: input, shape index: {}]   ;;  %s2557_s6 = inlined_call_operand.vmem [shape: f32[8,1,8], index: 6, kind: input, shape index: {}]   ;;  %s2558_s7 = inlined_call_operand.vmem [shape: f32[8,32,8], index: 7, kind: input, shape index: {}]   ;;  %s2559_s8 = inlined_call_operand.vmem [shape: f32[8,1,8], index: 8, kind: input, shape index: {}]   ;;  %s2560_s9 = inlined_call_operand.vmem [shape: f32[8,8,32], index: 9, kind: input, shape index: {}]   ;;  %s2561_s10 = inlined_call_operand.vmem [shape: f32[1,32], index: 10, kind: input, shape index: {}]   ;;  %s2562_s11 = inlined_call_operand.vmem [shape: f32[1,32], index: 11, kind: input, shape index: {}]   ;;  %s2563_s12 = inlined_call_operand.vmem [shape: f32[1,32], index: 12, kind: input, shape index: {}]   ;;  %s2564_s13 = inlined_call_operand.vmem [shape: f32[32,128], index: 13, kind: input, shape index: {}]   ;;  %s2565_s14 = inlined_call_operand.vmem [shape: f32[1,128], index: 14, kind: input, shape index: {}]   ;;  %s2566_s15 = inlined_call_operand.vmem [shape: f32[128,32], index: 15, kind: input, shape index: {}]   ;;  %s2567_s16 = inlined_call_operand.vmem [shape: f32[1,32], index: 16, kind: input, shape index: {}]   ;;  %s2568_s17 = inlined_call_operand.hbm [shape: f32[16,32], index: 17, kind: output, shape index: {}]  }
   0x1   :  { %2570 = sst [smem:[#allocation5_spill]] %s2551_s0 }
   0x2   :  { %2571 = sst [smem:[#allocation6_spill]] %s2552_s1 }
   0x3   :  { %s2572_s26 = sld [smem:[#allocation5_spill]]  ;;  %vm59_vm0 = vcmask 261120  }
   0x9   :  { %v57_v0 = vld [vmem:[%s2572_s26] sm:$0xff]  ;;  %v58_v1 = vld [vmem:[%s2572_s26 + $0x8] sm:$0xff] }
   0xa   :  { %v60_v2 = vsel %vm59_vm0, %v57_v0, 0.0  ;;  %v63_v3 = vsel %vm59_vm0, %v58_v1, 0.0 }
   0xb   :  { %61 = vadd.xlane.f32.xlu0 %v60_v2 }
  0x13   :  { %64 = vadd.xlane.f32.xlu0 %v63_v3 }
  0x14   :  { %22 = vsyncpa [#allocation3], 0  ;;  %v1819_v4 = vmov 32.0   ;;  %v126_v21 = vld [vmem:[%s2554_s3 + $0x18] sm:$0xff]  ;;  %v125_v24 = vld [vmem:[%s2554_s3 + $0x10] sm:$0xff]  ;;  %s2573_s24 = sld [smem:[#allocation6_spill]] }
  0x15   :  { %1749 = vrcp.f32 %v1819_v4  ;;  %v130_v22 = vld [vmem:[%s2554_s3 + $0x38] sm:$0xff]  ;;  %202 = vmatpush.msra.mxu0 %v126_v21  ;;  %v129_v25 = vld [vmem:[%s2554_s3 + $0x30] sm:$0xff]  ;;  %v124_v27 = vld [vmem:[%s2554_s3 + $0x8] sm:$0xff]  ;;  %vm801_vm8 = vcmask 64512  }
  0x16   :  { %v138_v23 = vld [vmem:[%s2554_s3 + $0x78] sm:$0xff]  ;;  %222 = vmatpush.msra.mxu2 %v130_v22  ;;  %v137_v26 = vld [vmem:[%s2554_s3 + $0x70] sm:$0xff]  ;;  %v128_v28 = vld [vmem:[%s2554_s3 + $0x28] sm:$0xff] }
  0x17   :  { %262 = vmatpush.msra.mxu3 %v138_v23  ;;  %203 = vmatpush.msra.mxu0 %v125_v24  ;;  %v136_v29 = vld [vmem:[%s2554_s3 + $0x68] sm:$0xff]  ;;  %v123_v30 = vld [vmem:[%s2554_s3] sm:$0xff]  ;;  %v134_v33 = vld [vmem:[%s2554_s3 + $0x58] sm:$0xff] }
  0x18   :  { %223 = vmatpush.msra.mxu2 %v129_v25  ;;  %v127_v31 = vld [vmem:[%s2554_s3 + $0x20] sm:$0xff]  ;;  %v142_v34 = vld [vmem:[%s2554_s3 + $0x98] sm:$0xff]  ;;  %v133_v38 = vld [vmem:[%s2554_s3 + $0x50] sm:$0xff] }
  0x19   :  { %263 = vmatpush.msra.mxu3 %v137_v26  ;;  %204 = vmatpush.msra.mxu0 %v124_v27  ;;  %v135_v32 = vld [vmem:[%s2554_s3 + $0x60] sm:$0xff]  ;;  %v146_v35 = vld [vmem:[%s2554_s3 + $0xb8] sm:$0xff]  ;;  %v141_v39 = vld [vmem:[%s2554_s3 + $0x90] sm:$0xff] }
  0x1a   :  { %224 = vmatpush.msra.mxu2 %v128_v28  ;;  %v376_v36 = vld [vmem:[%s2556_s5 + $0xb8] sm:$0xff]  ;;  %v145_v40 = vld [vmem:[%s2554_s3 + $0xb0] sm:$0xff]  ;;  %v132_v43 = vld [vmem:[%s2554_s3 + $0x48] sm:$0xff] }
  0x1b   :  { %v1750_v5 = vpop.eup %1749  ;;  %264 = vmatpush.msra.mxu3 %v136_v29  ;;  %205 = vmatpush.msra.mxu0 %v123_v30  ;;  %v375_v42 = vld [vmem:[%s2556_s5 + $0xb0] sm:$0xff]  ;;  %v140_v44 = vld [vmem:[%s2554_s3 + $0x88] sm:$0xff]  ;;  %v131_v48 = vld [vmem:[%s2554_s3 + $0x40] sm:$0xff] }
  0x1c   :  { %v67_v6 = vmul.f32 32.0, %v1750_v5  ;;  %vm71_vm1 = vweird.f32 %v1750_v5  ;;  %225 = vmatpush.msra.mxu2 %v127_v31  ;;  %529 = vmatpush.msra.mxu1 %v376_v36  ;;  %v144_v45 = vld [vmem:[%s2554_s3 + $0xa8] sm:$0xff]  ;;  %v139_v49 = vld [vmem:[%s2554_s3 + $0x80] sm:$0xff]  ;;  %v584_v52 = vld [vmem:[%s2558_s7 + $0x38] sm:$0xff] }
  0x1d   :  { %265 = vmatpush.msra.mxu3 %v135_v32  ;;  %285 = vmatpush.msrb.mxu0 %v142_v34  ;;  %v374_v47 = vld [vmem:[%s2556_s5 + $0xa8] sm:$0xff]  ;;  %v143_v50 = vld [vmem:[%s2554_s3 + $0xa0] sm:$0xff]  ;;  %v583_v54 = vld [vmem:[%s2558_s7 + $0x30] sm:$0xff] }
  0x1e   :  { %v68_v7 = vsub.f32 1.0, %v67_v6  ;;  %242 = vmatpush.msrb.mxu2 %v134_v33  ;;  %530 = vmatpush.msra.mxu1 %v375_v42  ;;  %v373_v51 = vld [vmem:[%s2556_s5 + $0xa0] sm:$0xff]  ;;  %v582_v56 = vld [vmem:[%s2558_s7 + $0x28] sm:$0xff]  ;;  %v355_v21 = vld [vmem:[%s2556_s5 + $0x10] sm:$0xff] }
  0x1f   :  { %305 = vmatpush.msrb.mxu3 %v146_v35  ;;  %286 = vmatpush.msrb.mxu0 %v141_v39  ;;  %v581_v59 = vld [vmem:[%s2558_s7 + $0x20] sm:$0xff]  ;;  %v148_v23 = vld [vmem:[%s2554_s3 + $0xc8] sm:$0xff]  ;;  %v360_v30 = vld [vmem:[%s2556_s5 + $0x38] sm:$0xff] }
  0x20   :  { %v69_v8 = vmul.f32 %v1750_v5, %v68_v7  ;;  %243 = vmatpush.msrb.mxu2 %v133_v38  ;;  %531 = vmatpush.msra.mxu1 %v374_v47  ;;  %v1718_v3 = vld [vmem:[%s2573_s24] ss:$0 sm:$0xff]  ;;  %v152_v24 = vld [vmem:[%s2554_s3 + $0xe8] sm:$0xff]  ;;  %v368_v31 = vld [vmem:[%s2556_s5 + $0x78] sm:$0xff] }
  0x21   :  { %306 = vmatpush.msrb.mxu3 %v145_v40  ;;  %287 = vmatpush.msrb.mxu0 %v140_v44  ;;  %v1719_v6 = vld [vmem:[%s2553_s2] ss:$0 sm:$0xff]  ;;  %v354_v25 = vld [vmem:[%s2556_s5 + $0x8] sm:$0xff]  ;;  %v372_v32 = vld [vmem:[%s2556_s5 + $0x98] sm:$0xff] }
  0x22   :  { %v70_v9 = vadd.f32 %v1750_v5, %v69_v8  ;;  %244 = vmatpush.msrb.mxu2 %v132_v43  ;;  %532 = vmatpush.msra.mxu1 %v373_v51  ;;  %v151_v28 = vld [vmem:[%s2554_s3 + $0xe0] sm:$0xff]  ;;  %v600_v33 = vld [vmem:[%s2558_s7 + $0xb8] sm:$0xff]  ;;  %v359_v34 = vld [vmem:[%s2556_s5 + $0x30] sm:$0xff] }
  0x23   :  { %307 = vmatpush.msrb.mxu3 %v144_v45  ;;  %288 = vmatpush.msrb.mxu0 %v139_v49  ;;  %v353_v29 = vld [vmem:[%s2556_s5] sm:$0xff]  ;;  %v367_v35 = vld [vmem:[%s2556_s5 + $0x70] sm:$0xff]  ;;  %v358_v38 = vld [vmem:[%s2556_s5 + $0x28] sm:$0xff] }
  0x24   :  { %v1921_v10 = vsel %vm71_vm1, %v1750_v5, %v70_v9  ;;  %245 = vmatpush.msrb.mxu2 %v131_v48  ;;  %673 = vmatpush.msrb.mxu1 %v584_v52  ;;  %v371_v36 = vld [vmem:[%s2556_s5 + $0x90] sm:$0xff]  ;;  %v366_v39 = vld [vmem:[%s2556_s5 + $0x68] sm:$0xff]  ;;  %v357_v42 = vld [vmem:[%s2556_s5 + $0x20] sm:$0xff] }
  0x25   :  { %308 = vmatpush.msrb.mxu3 %v143_v50  ;;  %v370_v40 = vld [vmem:[%s2556_s5 + $0x88] sm:$0xff]  ;;  %v365_v43 = vld [vmem:[%s2556_s5 + $0x60] sm:$0xff]  ;;  %v384_v47 = vld [vmem:[%s2556_s5 + $0xf8] sm:$0xff] }
  0x26   :  { %674 = vmatpush.msrb.mxu1 %v583_v54  ;;  %v369_v44 = vld [vmem:[%s2556_s5 + $0x80] sm:$0xff]  ;;  %v580_v48 = vld [vmem:[%s2558_s7 + $0x18] sm:$0xff]  ;;  %v363_v49 = vld [vmem:[%s2556_s5 + $0x50] sm:$0xff] }
  0x27   :  { %v597_v45 = vld [vmem:[%s2558_s7 + $0xa0] sm:$0xff]  ;;  %v383_v50 = vld [vmem:[%s2556_s5 + $0xf0] sm:$0xff]  ;;  %v362_v52 = vld [vmem:[%s2556_s5 + $0x48] sm:$0xff] }
  0x28   :  { %675 = vmatpush.msrb.mxu1 %v582_v56  ;;  %v579_v51 = vld [vmem:[%s2558_s7 + $0x10] sm:$0xff]  ;;  %v578_v54 = vld [vmem:[%s2558_s7 + $0x8] sm:$0xff]  ;;  %v381_v56 = vld [vmem:[%s2556_s5 + $0xe0] sm:$0xff] }
  0x2a   :  { %676 = vmatpush.msrb.mxu1 %v581_v59  ;;  %v592_v59 = vld [vmem:[%s2558_s7 + $0x78] sm:$0xff] }
  0x7e   :  { %v62_v11 = vpop.xlane.xlu0 %61 }
  0x7f   :  { %v73_v12 = vmul.f32 %v1921_v10, %v62_v11 }
  0x81   :  { %v1924_v13 = vsub.f32 %v57_v0, %v73_v12 }
  0x83   :  { %v77_v14 = vmul.f32 %v1924_v13, %v1924_v13 }
  0x85   :  { %v79_v15 = vsel %vm59_vm0, %v77_v14, 0.0  ;;  %v150_v14 = vld [vmem:[%s2554_s3 + $0xd8] sm:$0xff] }
  0x86   :  { %80 = vadd.xlane.f32.xlu1 %v79_v15  ;;  %v65_v16 = vpop.xlane.xlu0 %64 }
  0x87   :  { %v74_v17 = vmul.f32 %v1921_v10, %v65_v16  ;;  %v154_v16 = vld [vmem:[%s2554_s3 + $0xf8] sm:$0xff] }
  0x89   :  { %v1930_v18 = vsub.f32 %v58_v1, %v74_v17  ;;  %v149_v17 = vld [vmem:[%s2554_s3 + $0xd0] sm:$0xff] }
  0x8b   :  { %v78_v19 = vmul.f32 %v1930_v18, %v1930_v18 }
  0x8d   :  { %v82_v20 = vsel %vm59_vm0, %v78_v19, 0.0 }
  0x8e   :  { %83 = vadd.xlane.f32.xlu1 %v82_v20  ;;  %v153_v20 = vld [vmem:[%s2554_s3 + $0xf0] sm:$0xff] }
  0xf9   :  { %v81_v37 = vpop.xlane.xlu1 %80 }
  0xfa   :  { %v85_v41 = vmul.f32 %v81_v37, %v1921_v10  ;;  %v599_v37 = vld [vmem:[%s2558_s7 + $0xb0] sm:$0xff] }
  0xfc   :  { %v87_v46 = vadd.f32 1e-05, %v85_v41  ;;  %v598_v41 = vld [vmem:[%s2558_s7 + $0xa8] sm:$0xff] }
  0xfe   :  { %1751 = vrsqrt.f32 %v87_v46  ;;  %vm95_vm3 = vweird.f32 %v87_v46 }
 0x101   :  { %v84_v53 = vpop.xlane.xlu1 %83 }
 0x102   :  { %v86_v55 = vmul.f32 %v84_v53, %v1921_v10  ;;  %v382_v53 = vld [vmem:[%s2556_s5 + $0xe8] sm:$0xff] }
 0x104   :  { %v1752_v57 = vpop.eup %1751  ;;  %v88_v58 = vadd.f32 1e-05, %v86_v55  ;;  %v361_v55 = vld [vmem:[%s2556_s5 + $0x40] sm:$0xff] }
 0x105   :  { %v90_v60 = vmul.f32 %v1752_v57, %v87_v46  ;;  %vm96_vm2 = vweird.f32 %v1752_v57  ;;  %v364_v46 = vld [vmem:[%s2556_s5 + $0x58] sm:$0xff] }
 0x106   :  { %1753 = vrsqrt.f32 %v88_v58  ;;  %vm97_vm4 = vmor %vm95_vm3, %vm96_vm2  ;;  %vm105_vm5 = vweird.f32 %v88_v58 }
 0x107   :  { %v91_v61 = vmul.f32 %v1752_v57, %v90_v60  ;;  %v596_v60 = vld [vmem:[%s2558_s7 + $0x98] sm:$0xff] }
 0x109   :  { %v92_v62 = vmul.f32 0.5, %v91_v61  ;;  %v379_v61 = vld [vmem:[%s2556_s5 + $0xd0] sm:$0xff] }
 0x10b   :  { %v93_v63 = vsub.f32 1.5, %v92_v62  ;;  %v595_v62 = vld [vmem:[%s2558_s7 + $0x90] sm:$0xff] }
 0x10c   :  { %v1754_v0 = vpop.eup %1753 }
 0x10d   :  { %v94_v1 = vmul.f32 %v1752_v57, %v93_v63  ;;  %v100_v2 = vmul.f32 %v1754_v0, %v88_v58  ;;  %vm106_vm6 = vweird.f32 %v1754_v0  ;;  %v577_v58 = vld [vmem:[%s2558_s7] sm:$0xff]  ;;  %v591_v63 = vld [vmem:[%s2558_s7 + $0x70] sm:$0xff] }
 0x10e   :  { %vm107_vm7 = vmor %vm105_vm5, %vm106_vm6 }
 0x10f   :  { %v98_v4 = vsel %vm97_vm4, %v1752_v57, %v94_v1  ;;  %v101_v5 = vmul.f32 %v1754_v0, %v100_v2  ;;  %v380_v57 = vld [vmem:[%s2556_s5 + $0xd8] sm:$0xff]  ;;  %v594_v1 = vld [vmem:[%s2558_s7 + $0x88] sm:$0xff] }
 0x110   :  { %v109_v7 = vmul.f32 %v98_v4, %v1924_v13  ;;  %v356_v13 = vld [vmem:[%s2556_s5 + $0x18] sm:$0xff]  ;;  %v590_v2 = vld [vmem:[%s2558_s7 + $0x68] sm:$0xff]  ;;  %v593_v4 = vld [vmem:[%s2558_s7 + $0x80] sm:$0xff] }
 0x111   :  { %v102_v8 = vmul.f32 0.5, %v101_v5  ;;  %v588_v5 = vld [vmem:[%s2558_s7 + $0x58] sm:$0xff] }
 0x112   :  { %v115_v9 = vmul.f32 %v1718_v3, %v109_v7  ;;  %v608_v7 = vld [vmem:[%s2558_s7 + $0xf8] sm:$0xff] }
 0x113   :  { %v103_v11 = vsub.f32 1.5, %v102_v8  ;;  %v587_v8 = vld [vmem:[%s2558_s7 + $0x50] sm:$0xff] }
 0x114   :  { %v2040_v12 = vadd.f32 %v1719_v6, %v115_v9  ;;  %v586_v9 = vld [vmem:[%s2558_s7 + $0x48] sm:$0xff] }
 0x115   :  { %v104_v15 = vmul.f32 %v1754_v0, %v103_v11  ;;  %v607_v11 = vld [vmem:[%s2558_s7 + $0xf0] sm:$0xff] }
 0x116   :  { %1656 = vmatmul.msk.f32.vlgmr.msra.gmra.mxu0 %vm59_vm0, %v2040_v12  ;;  %1657 = vmatmul.msk.f32.vlgmr.msra.gmra.mxu2 %vm59_vm0, %v2040_v12 }
 0x117   :  { %v108_v19 = vsel %vm107_vm7, %v1754_v0, %v104_v15  ;;  %1659 = vmatmul.msk.f32.vlgmr.msra.gmra.mxu3 %vm59_vm0, %v2040_v12  ;;  %325 = vmatpush.msra.mxu2 %v150_v14  ;;  %v378_v0 = vld [vmem:[%s2556_s5 + $0xc8] sm:$0xff]  ;;  %v585_v14 = vld [vmem:[%s2558_s7 + $0x40] sm:$0xff] }
 0x118   :  { %v110_v22 = vmul.f32 %v108_v19, %v1930_v18  ;;  %345 = vmatpush.msra.mxu3 %v154_v16  ;;  %429 = vmatpush.msra.mxu0 %v356_v13  ;;  %v147_v18 = vld [vmem:[%s2554_s3 + $0xc0] sm:$0xff]  ;;  %v606_v15 = vld [vmem:[%s2558_s7 + $0xe8] sm:$0xff]  ;;  %v604_v16 = vld [vmem:[%s2558_s7 + $0xd8] sm:$0xff] }
 0x119   :  { %326 = vmatpush.msra.mxu2 %v149_v17  ;;  %v605_v13 = vld [vmem:[%s2558_s7 + $0xe0] sm:$0xff]  ;;  %v603_v17 = vld [vmem:[%s2558_s7 + $0xd0] sm:$0xff]  ;;  %v602_v19 = vld [vmem:[%s2558_s7 + $0xc8] sm:$0xff] }
 0x11a   :  { %v116_v26 = vmul.f32 %v1718_v3, %v110_v22  ;;  %346 = vmatpush.msra.mxu3 %v153_v20  ;;  %430 = vmatpush.msra.mxu0 %v355_v21  ;;  %v377_v3 = vld [vmem:[%s2556_s5 + $0xc0] sm:$0xff] }
 0x11b   :  { %327 = vmatpush.msra.mxu2 %v148_v23  ;;  %v601_v20 = vld [vmem:[%s2558_s7 + $0xc0] sm:$0xff] }
 0x11c   :  { %v2079_v27 = vadd.f32 %v1719_v6, %v116_v26  ;;  %347 = vmatpush.msra.mxu3 %v152_v24  ;;  %431 = vmatpush.msra.mxu0 %v354_v25  ;;  %v589_v6 = vld [vmem:[%s2558_s7 + $0x60] sm:$0xff] }
 0x11d   :  { %328 = vmatpush.msra.mxu2 %v147_v18  ;;  %v1720_v18 = vld [vmem:[%s2555_s4] ss:$0 sm:$0xff] }
 0x11e   :  { %1658 = vmatmul.msk.f32.vlgmr.msrb.gmra.mxu2 %vm59_vm0, %v2040_v12  ;;  %1660 = vmatmul.msk.f32.vlgmr.msrb.gmra.mxu0 %vm59_vm0, %v2079_v27 }
 0x11f   :  { %1661 = vmatmul.msk.f32.vlgmr.msrb.gmra.mxu3 %vm59_vm0, %v2079_v27  ;;  %1669 = vmatmul.msk.f32.vlgmr.msra.gmra.mxu1 %vm59_vm0, %v2079_v27 }
 0x120   :  { %348 = vmatpush.msra.mxu3 %v151_v28  ;;  %432 = vmatpush.msra.mxu0 %v353_v29 }
 0x121   :  { %449 = vmatpush.msrb.mxu2 %v360_v30  ;;  %753 = vmatpush.msra.mxu1 %v600_v33 }
 0x122   :  { %489 = vmatpush.msrb.mxu3 %v368_v31  ;;  %509 = vmatpush.msrb.mxu0 %v372_v32  ;;  %v1731_v31 = vld [vmem:[%s2557_s6 + $0x4] ss:$0 sm:$0xff] }
 0x123   :  { %450 = vmatpush.msrb.mxu2 %v359_v34  ;;  %754 = vmatpush.msra.mxu1 %v599_v37  ;;  %v1723_v34 = vld [vmem:[%s2555_s4 + $0x4] ss:$0 sm:$0xff]  ;;  %v1733_v37 = vld [vmem:[%s2557_s6 + $0x1] ss:$0 sm:$0xff] }
 0x124   :  { %490 = vmatpush.msrb.mxu3 %v367_v35  ;;  %510 = vmatpush.msrb.mxu0 %v371_v36 }
 0x125   :  { %451 = vmatpush.msrb.mxu2 %v358_v38  ;;  %755 = vmatpush.msra.mxu1 %v598_v41  ;;  %v1735_v41 = vld [vmem:[%s2559_s8] ss:$0 sm:$0xff] }
 0x126   :  { %491 = vmatpush.msrb.mxu3 %v366_v39  ;;  %1662 = vmatmul.msk.f32.vlgmr.msra.gmra.mxu2 %vm59_vm0, %v2079_v27  ;;  %v1724_v39 = vld [vmem:[%s2557_s6 + $0x5] ss:$0 sm:$0xff] }
 0x127   :  { %1664 = vmatmul.msk.f32.vlgmr.msra.gmra.mxu0 %vm59_vm0, %v2040_v12  ;;  %1663 = vmatmul.msk.f32.vlgmr.msra.gmra.mxu3 %vm59_vm0, %v2079_v27 }
 0x128   :  { %1673 = vmatmul.msk.f32.vlgmr.msrb.gmra.mxu1 %vm59_vm0, %v2040_v12  ;;  %511 = vmatpush.msrb.mxu0 %v370_v40  ;;  %v1734_v40 = vld [vmem:[%s2557_s6 + $0x3] ss:$0 sm:$0xff] }
 0x129   :  { %452 = vmatpush.msrb.mxu2 %v357_v42  ;;  %492 = vmatpush.msrb.mxu3 %v365_v43  ;;  %v1721_v42 = vld [vmem:[%s2555_s4 + $0x1] ss:$0 sm:$0xff] }
 0x12a   :  { %512 = vmatpush.msrb.mxu0 %v369_v44  ;;  %756 = vmatpush.msra.mxu1 %v597_v45  ;;  %v1722_v45 = vld [vmem:[%s2555_s4 + $0x3] ss:$0 sm:$0xff] }
 0x12b   :  { %469 = vmatpush.msra.mxu2 %v364_v46  ;;  %569 = vmatpush.msra.mxu3 %v384_v47  ;;  %v1728_v46 = vld [vmem:[%s2559_s8 + $0x1] ss:$0 sm:$0xff] }
 0x12c   :  { %653 = vmatpush.msra.mxu0 %v580_v48 }
 0x12d   :  { %470 = vmatpush.msra.mxu2 %v363_v49  ;;  %570 = vmatpush.msra.mxu3 %v383_v50 }
 0x12e   :  { %1665 = vmatmul.msk.f32.vlgmr.msrb.gmra.mxu2 %vm59_vm0, %v2040_v12  ;;  %654 = vmatpush.msra.mxu0 %v579_v51 }
 0x12f   :  { %1668 = vmatmul.msk.f32.vlgmr.msrb.gmra.mxu0 %vm59_vm0, %v2079_v27  ;;  %1667 = vmatmul.msk.f32.vlgmr.msrb.gmra.mxu3 %vm59_vm0, %v2040_v12 }
 0x130   :  { %1677 = vmatmul.msk.f32.vlgmr.msra.gmra.mxu1 %vm59_vm0, %v2079_v27  ;;  %471 = vmatpush.msra.mxu2 %v362_v52 }
 0x131   :  { %571 = vmatpush.msra.mxu3 %v382_v53  ;;  %655 = vmatpush.msra.mxu0 %v578_v54 }
 0x132   :  { %472 = vmatpush.msra.mxu2 %v361_v55 }
 0x133   :  { %572 = vmatpush.msra.mxu3 %v381_v56  ;;  %656 = vmatpush.msra.mxu0 %v577_v58  ;;  %v1736_v56 = vld [vmem:[%s2557_s6 + $0x2] ss:$0 sm:$0xff]  ;;  %v1738_v58 = vld [vmem:[%s2559_s8 + $0x4] ss:$0 sm:$0xff] }
 0x134   :  { %549 = vmatpush.msrb.mxu2 %v380_v57  ;;  %v1737_v57 = vld [vmem:[%s2557_s6 + $0x7] ss:$0 sm:$0xff] }
 0x135   :  { %713 = vmatpush.msrb.mxu3 %v592_v59  ;;  %733 = vmatpush.msrb.mxu0 %v596_v60  ;;  %v1725_v59 = vld [vmem:[%s2555_s4 + $0x2] ss:$0 sm:$0xff]  ;;  %v1726_v60 = vld [vmem:[%s2555_s4 + $0x5] ss:$0 sm:$0xff] }
 0x136   :  { %550 = vmatpush.msrb.mxu2 %v379_v61 }
 0x137   :  { %1666 = vmatmul.msk.f32.vlgmr.msra.gmra.mxu2 %vm59_vm0, %v2040_v12  ;;  %1672 = vmatmul.msk.f32.vlgmr.msra.gmra.mxu0 %vm59_vm0, %v2040_v12 }
 0x138   :  { %1671 = vmatmul.msk.f32.vlgmr.msra.gmra.mxu3 %vm59_vm0, %v2079_v27  ;;  %734 = vmatpush.msrb.mxu0 %v595_v62  ;;  %v1730_v62 = vld [vmem:[%s2555_s4 + $0x7] ss:$0 sm:$0xff] }
 0x139   :  { %714 = vmatpush.msrb.mxu3 %v591_v63  ;;  %551 = vmatpush.msrb.mxu2 %v378_v0  ;;  %v1732_v63 = vld [vmem:[%s2559_s8 + $0x5] ss:$0 sm:$0xff] }
 0x13a   :  { %735 = vmatpush.msrb.mxu0 %v594_v1 }
 0x13b   :  { %715 = vmatpush.msrb.mxu3 %v590_v2  ;;  %552 = vmatpush.msrb.mxu2 %v377_v3 }
 0x13c   :  { %736 = vmatpush.msrb.mxu0 %v593_v4 }
 0x13d   :  { %693 = vmatpush.msra.mxu2 %v588_v5  ;;  %716 = vmatpush.msrb.mxu3 %v589_v6 }
 0x13f   :  { %793 = vmatpush.msra.mxu3 %v608_v7  ;;  %694 = vmatpush.msra.mxu2 %v587_v8 }
 0x140   :  { %1670 = vmatmul.msk.f32.vlgmr.msrb.gmra.mxu2 %vm59_vm0, %v2079_v27  ;;  %1676 = vmatmul.msk.f32.vlgmr.msrb.gmra.mxu0 %vm59_vm0, %v2079_v27 }
 0x141   :  { %1675 = vmatmul.msk.f32.vlgmr.msrb.gmra.mxu3 %vm59_vm0, %v2040_v12  ;;  %695 = vmatpush.msra.mxu2 %v586_v9 }
 0x142   :  { %794 = vmatpush.msra.mxu3 %v607_v11  ;;  %v1739_v11 = vld [vmem:[%s2557_s6 + $0x6] ss:$0 sm:$0xff] }
 0x143   :  { %696 = vmatpush.msra.mxu2 %v585_v14  ;;  %v1740_v14 = vld [vmem:[%s2559_s8 + $0x3] ss:$0 sm:$0xff] }
 0x144   :  { %795 = vmatpush.msra.mxu3 %v606_v15  ;;  %v1729_v15 = vld [vmem:[%s2555_s4 + $0x6] ss:$0 sm:$0xff]  ;;  %s1822_s4 = smov 8  }
 0x145   :  { %773 = vmatpush.msrb.mxu2 %v604_v16 }
 0x146   :  { %796 = vmatpush.msra.mxu3 %v605_v13 }
 0x147   :  { %774 = vmatpush.msrb.mxu2 %v603_v17 }
 0x148   :  { %1674 = vmatmul.msk.f32.vlgmr.msra.gmra.mxu2 %vm59_vm0, %v2040_v12  ;;  %v1727_v12 = vld [vmem:[%s2557_s6] ss:$0 sm:$0xff] }
 0x149   :  { %1679 = vmatmul.msk.f32.vlgmr.msra.gmra.mxu3 %vm59_vm0, %v2079_v27  ;;  %775 = vmatpush.msrb.mxu2 %v602_v19 }
 0x14b   :  { %776 = vmatpush.msrb.mxu2 %v601_v20 }
 0x150   :  { %1678 = vmatmul.msk.f32.vlgmr.msrb.gmra.mxu2 %vm59_vm0, %v2079_v27 }
 0x193   :  { %v207_v21 = vpop.f32.mrf.mxu0 }
 0x194   :  { %v208_v27 = vadd.f32 %v1720_v18, %v207_v21  ;;  %v1741_v21 = vld [vmem:[%s2559_s8 + $0x2] ss:$0 sm:$0xff] }
 0x199   :  { %v227_v22 = vpop.f32.mrf.mxu2 }
 0x19a   :  { %v267_v23 = vpop.f32.mrf.mxu3  ;;  %v228_v53 = vadd.f32 %v1721_v42, %v227_v22  ;;  %v1742_v22 = vld [vmem:[%s2559_s8 + $0x7] ss:$0 sm:$0xff] }
 0x19b   :  { %v290_v24 = vpop.f32.mrf.mxu0  ;;  %v268_v54 = vadd.f32 %v1722_v45, %v267_v23 }
 0x19c   :  { %v534_v30 = vpop.f32.mrf.mxu1  ;;  %v291_v38 = vadd.f32 %v1723_v34, %v290_v24 }
 0x19d   :  { %v535_v49 = vadd.f32 %v1724_v39, %v534_v30 }
 0x1a1   :  { %v247_v25 = vpop.f32.mrf.mxu2 }
 0x1a2   :  { %v310_v26 = vpop.f32.mrf.mxu3  ;;  %v248_v6 = vadd.f32 %v1725_v59, %v247_v25 }
 0x1a3   :  { %v311_v7 = vadd.f32 %v1726_v60, %v310_v26  ;;  %v1743_v26 = vld [vmem:[%s2559_s8 + $0x6] ss:$0 sm:$0xff] }
 0x1a4   :  { %v434_v28 = vpop.f32.mrf.mxu0 }
 0x1a5   :  { %v435_v29 = vadd.f32 %v1727_v12, %v434_v28  ;;  %v678_v43 = vpop.f32.mrf.mxu1 }
 0x1a6   :  { %v679_v55 = vadd.f32 %v1728_v46, %v678_v43 }
 0x1a7   :  { %1680 = vmatpush.xpose.msk.msra.mxu0 %vm801_vm8, %v435_v29 }
 0x1a9   :  { %v2295_v32 = vpop.f32.mrf.mxu2 }
 0x1aa   :  { %1681 = vmatmul.msk.f32.vlgmr.msra.gmra.mxu0 %vm801_vm8, %v208_v27  ;;  %v350_v33 = vpop.f32.mrf.mxu3  ;;  %v331_v20 = vadd.f32 %v1729_v15, %v2295_v32 }
 0x1ab   :  { %v351_v8 = vadd.f32 %v1730_v62, %v350_v33 }
 0x1ac   :  { %v514_v35 = vpop.f32.mrf.mxu0 }
 0x1ad   :  { %v515_v36 = vadd.f32 %v1731_v31, %v514_v35  ;;  %v758_v2 = vpop.f32.mrf.mxu1 }
 0x1ae   :  { %v759_v9 = vadd.f32 %v1732_v63, %v758_v2 }
 0x1af   :  { %1688 = vmatpush.xpose.msk.msrb.mxu0 %vm801_vm8, %v515_v36 }
 0x1b1   :  { %v454_v44 = vpop.f32.mrf.mxu2 }
 0x1b2   :  { %1689 = vmatmul.msk.f32.vlgmr.msrb.gmra.mxu0 %vm801_vm8, %v291_v38  ;;  %v455_v47 = vadd.f32 %v1733_v37, %v454_v44  ;;  %v494_v48 = vpop.f32.mrf.mxu3 }
 0x1b3   :  { %v495_v50 = vadd.f32 %v1734_v40, %v494_v48 }
 0x1b4   :  { %v658_v51 = vpop.f32.mrf.mxu0  ;;  %1682 = vmatpush.xpose.msk.msrb.mxu1 %vm801_vm8, %v455_v47 }
 0x1b5   :  { %v659_v52 = vadd.f32 %v1735_v41, %v658_v51  ;;  %1686 = vmatpush.xpose.msk.msrb.mxu3 %vm801_vm8, %v495_v50 }
 0x1b7   :  { %1116 = vmatpush.msra.mxu0 %v659_v52  ;;  %1683 = vmatmul.msk.f32.vlgmr.msrb.gmra.mxu1 %vm801_vm8, %v228_v53 }
 0x1b8   :  { %1690 = vmatpush.xpose.msk.msra.mxu1 %vm801_vm8, %v535_v49  ;;  %1687 = vmatmul.msk.f32.vlgmr.msrb.gmra.mxu3 %vm801_vm8, %v268_v54 }
 0x1ba   :  { %v474_v61 = vpop.f32.mrf.mxu2 }
 0x1bb   :  { %v475_v0 = vadd.f32 %v1736_v56, %v474_v61  ;;  %v574_v1 = vpop.f32.mrf.mxu3 }
 0x1bc   :  { %1139 = vmatpush.msrb.mxu1 %v679_v55  ;;  %v575_v3 = vadd.f32 %v1737_v57, %v574_v1 }
 0x1bd   :  { %v738_v4 = vpop.f32.mrf.mxu0  ;;  %1684 = vmatpush.xpose.msk.msra.mxu2 %vm801_vm8, %v475_v0 }
 0x1be   :  { %v739_v5 = vadd.f32 %v1738_v58, %v738_v4  ;;  %1694 = vmatpush.xpose.msk.msra.mxu3 %vm801_vm8, %v575_v3 }
 0x1bf   :  { %1691 = vmatmul.msk.f32.vlgmr.msra.gmra.mxu1 %vm801_vm8, %v311_v7 }
 0x1c0   :  { %1208 = vmatpush.msrb.mxu0 %v739_v5  ;;  %1685 = vmatmul.msk.f32.vlgmr.msra.gmra.mxu2 %vm801_vm8, %v248_v6 }
 0x1c1   :  { %1695 = vmatmul.msk.f32.vlgmr.msra.gmra.mxu3 %vm801_vm8, %v351_v8  ;;  %1231 = vmatpush.msra.mxu1 %v759_v9 }
 0x1c3   :  { %v554_v16 = vpop.f32.mrf.mxu2 }
 0x1c4   :  { %v555_v13 = vadd.f32 %v1739_v11, %v554_v16  ;;  %v718_v17 = vpop.f32.mrf.mxu3 }
 0x1c5   :  { %v719_v19 = vadd.f32 %v1740_v14, %v718_v17 }
 0x1c6   :  { %1692 = vmatpush.xpose.msk.msrb.mxu2 %vm801_vm8, %v555_v13 }
 0x1c7   :  { %1185 = vmatpush.msrb.mxu3 %v719_v19 }
 0x1c9   :  { %1693 = vmatmul.msk.f32.vlgmr.msrb.gmra.mxu2 %vm801_vm8, %v331_v20 }
 0x1cb   :  { %v698_v23 = vpop.f32.mrf.mxu2 }
 0x1cc   :  { %v699_v24 = vadd.f32 %v1741_v21, %v698_v23  ;;  %v798_v12 = vpop.f32.mrf.mxu3 }
 0x1cd   :  { %v799_v25 = vadd.f32 %v1742_v22, %v798_v12 }
 0x1ce   :  { %1162 = vmatpush.msra.mxu2 %v699_v24 }
 0x1cf   :  { %1277 = vmatpush.msra.mxu3 %v799_v25 }
 0x1d3   :  { %v778_v18 = vpop.f32.mrf.mxu2 }
 0x1d4   :  { %v779_v28 = vadd.f32 %v1743_v26, %v778_v18 }
 0x1d6   :  { %1254 = vmatpush.msrb.mxu2 %v779_v28 }
 0x227   :  { %v825_v29 = vpop.f32.mrf.mxu0 }
 0x228   :  { %v1010_v27 = vsel %vm801_vm8, %v825_v29, -inf }
 0x229   :  { %1011 = vmax.xlane.f32.xlu1 %v1010_v27 }
 0x22f   :  { %v929_v30 = vpop.f32.mrf.mxu0 }
 0x230   :  { %v1022_v31 = vsel %vm801_vm8, %v929_v30, -inf }
 0x231   :  { %1023 = vmax.xlane.f32.xlu1 %v1022_v31 }
 0x234   :  { %v851_v38 = vpop.f32.mrf.mxu1 }
 0x235   :  { %v1013_v40 = vsel %vm801_vm8, %v851_v38, -inf }
 0x23b   :  { %v903_v34 = vpop.f32.mrf.mxu3 }
 0x23c   :  { %v1019_v37 = vsel %vm801_vm8, %v903_v34, -inf  ;;  %v955_v42 = vpop.f32.mrf.mxu1 }
 0x23d   :  { %v1025_v43 = vsel %vm801_vm8, %v955_v42, -inf }
 0x243   :  { %v877_v32 = vpop.f32.mrf.mxu2 }
 0x244   :  { %v1016_v33 = vsel %vm801_vm8, %v877_v32, -inf  ;;  %v1007_v39 = vpop.f32.mrf.mxu3 }
 0x245   :  { %1017 = vmax.xlane.f32.xlu2 %v1016_v33  ;;  %v1031_v41 = vsel %vm801_vm8, %v1007_v39, -inf }
 0x24c   :  { %v981_v35 = vpop.f32.mrf.mxu2 }
 0x24d   :  { %v1028_v36 = vsel %vm801_vm8, %v981_v35, -inf  ;;  %1020 = vmax.xlane.f32.xlu2 %v1019_v37 }
 0x24e   :  { %1029 = vmax.xlane.f32.xlu0 %v1028_v36 }
 0x255   :  { %1014 = vmax.xlane.f32.xlu2 %v1013_v40 }
 0x256   :  { %1032 = vmax.xlane.f32.xlu0 %v1031_v41 }
 0x25d   :  { %1026 = vmax.xlane.f32.xlu2 %v1025_v43 }
 0x29c   :  { %v1012_v44 = vpop.xlane.xlu1 %1011 }
 0x29d   :  { %v1034_v47 = vsub.f32 %v825_v29, %v1012_v44 }
 0x29f   :  { %v1042_v49 = vmul.f32 1.442695, %v1034_v47  ;;  %v1285_v47 = vld [vmem:[%s2560_s9 + $0x18] sm:$0xff] }
 0x2a4   :  { %v1024_v50 = vpop.xlane.xlu1 %1023 }
 0x2a5   :  { %v1038_v56 = vsub.f32 %v929_v30, %v1024_v50  ;;  %v1286_v50 = vld [vmem:[%s2560_s9 + $0x20] sm:$0xff] }
 0x2a7   :  { %v1050_v60 = vmul.f32 1.442695, %v1038_v56 }
 0x2b8   :  { %v1018_v45 = vpop.xlane.xlu2 %1017 }
 0x2b9   :  { %v1036_v46 = vsub.f32 %v877_v32, %v1018_v45  ;;  %v1284_v45 = vld [vmem:[%s2560_s9 + $0x10] sm:$0xff] }
 0x2bb   :  { %v1046_v48 = vmul.f32 1.442695, %v1036_v46  ;;  %v1282_v46 = vld [vmem:[%s2560_s9] sm:$0xff] }
 0x2bd   :  { %1755 = vpow2.f32 %v1046_v48  ;;  %v1288_v48 = vld [vmem:[%s2560_s9 + $0x30] sm:$0xff] }
 0x2be   :  { %1757 = vpow2.f32 %v1042_v49  ;;  %v1283_v49 = vld [vmem:[%s2560_s9 + $0x8] sm:$0xff] }
 0x2c0   :  { %v1021_v52 = vpop.xlane.xlu2 %1020 }
 0x2c1   :  { %v1030_v51 = vpop.xlane.xlu0 %1029  ;;  %v1037_v54 = vsub.f32 %v903_v34, %v1021_v52  ;;  %v1287_v52 = vld [vmem:[%s2560_s9 + $0x28] sm:$0xff] }
 0x2c2   :  { %v1040_v53 = vsub.f32 %v981_v35, %v1030_v51  ;;  %v1289_v51 = vld [vmem:[%s2560_s9 + $0x38] sm:$0xff] }
 0x2c3   :  { %v1756_v55 = vpop.eup %1755  ;;  %v1048_v58 = vmul.f32 1.442695, %v1037_v54 }
 0x2c4   :  { %v1054_v57 = vmul.f32 1.442695, %v1040_v53  ;;  %v1064_v59 = vsel %vm801_vm8, %v1756_v55, 0.0  ;;  %v1758_v63 = vpop.eup %1757 }
 0x2c5   :  { %1065 = vadd.xlane.f32.xlu0 %v1064_v59  ;;  %v1058_v7 = vsel %vm801_vm8, %v1758_v63, 0.0 }
 0x2c6   :  { %1759 = vpow2.f32 %v1054_v57 }
 0x2c7   :  { %1761 = vpow2.f32 %v1048_v58 }
 0x2c8   :  { %v1015_v61 = vpop.xlane.xlu2 %1014  ;;  %1763 = vpow2.f32 %v1050_v60 }
 0x2c9   :  { %v1033_v62 = vpop.xlane.xlu0 %1032  ;;  %v1035_v0 = vsub.f32 %v851_v38, %v1015_v61 }
 0x2ca   :  { %v1041_v1 = vsub.f32 %v1007_v39, %v1033_v62 }
 0x2cb   :  { %v1044_v3 = vmul.f32 1.442695, %v1035_v0 }
 0x2cc   :  { %v1760_v2 = vpop.eup %1759  ;;  %v1056_v4 = vmul.f32 1.442695, %v1041_v1 }
 0x2cd   :  { %v1762_v5 = vpop.eup %1761  ;;  %v1076_v6 = vsel %vm801_vm8, %v1760_v2, 0.0  ;;  %1765 = vpow2.f32 %v1044_v3  ;;  %1059 = vadd.xlane.f32.xlu0 %v1058_v7 }
 0x2ce   :  { %1077 = vadd.xlane.f32.xlu2 %v1076_v6  ;;  %v1067_v8 = vsel %vm801_vm8, %v1762_v5, 0.0  ;;  %1767 = vpow2.f32 %v1056_v4  ;;  %v1764_v11 = vpop.eup %1763  ;;  %v1744_v6 = vld [vmem:[%s2561_s10] ss:$0 sm:$0xff]  ;;  %s1644_s10 = sshll.u32 %s2568_s17, 4  ;;  %s1645_s10 = int_to_ptr.hbm [resolvable:$true] %s1644_s10 }
 0x2cf   :  { %1068 = vadd.xlane.f32.xlu1 %v1067_v8  ;;  %v1070_v19 = vsel %vm801_vm8, %v1764_v11, 0.0 }
 0x2d0   :  { %v1027_v9 = vpop.xlane.xlu2 %1026 }
 0x2d1   :  { %v1039_v14 = vsub.f32 %v955_v42, %v1027_v9 }
 0x2d3   :  { %v1766_v15 = vpop.eup %1765  ;;  %v1052_v16 = vmul.f32 1.442695, %v1039_v14 }
 0x2d4   :  { %v1768_v13 = vpop.eup %1767  ;;  %v1061_v17 = vsel %vm801_vm8, %v1766_v15, 0.0 }
 0x2d5   :  { %1769 = vpow2.f32 %v1052_v16  ;;  %v1079_v20 = vsel %vm801_vm8, %v1768_v13, 0.0  ;;  %1071 = vadd.xlane.f32.xlu0 %v1070_v19  ;;  %v1791_v19 = vld [vmem:[%s2572_s26] sm:$0xff] }
 0x2d6   :  { %1080 = vadd.xlane.f32.xlu2 %v1079_v20 }
 0x2d7   :  { %1062 = vadd.xlane.f32.xlu1 %v1061_v17 }
 0x2db   :  { %v1770_v21 = vpop.eup %1769 }
 0x2dc   :  { %v1073_v22 = vsel %vm801_vm8, %v1770_v21, 0.0 }
 0x2df   :  { %1074 = vadd.xlane.f32.xlu1 %v1073_v22 }
 0x338   :  { %v1066_v23 = vpop.xlane.xlu0 %1065 }
 0x339   :  { %1771 = vrcp.f32 %v1066_v23 }
 0x33f   :  { %v1772_v24 = vpop.eup %1771 }
 0x340   :  { %v1092_v12 = vmul.f32 %v1772_v24, %v1756_v55  ;;  %v1060_v26 = vpop.xlane.xlu0 %1059 }
 0x341   :  { %v1078_v25 = vpop.xlane.xlu2 %1077 }
 0x342   :  { %1773 = vrcp.f32 %v1078_v25  ;;  %v1069_v18 = vpop.xlane.xlu1 %1068  ;;  %1698 = vmatmul.msk.f32.vlgmr.msra.gmra.mxu2 %vm801_vm8, %v1092_v12 }
 0x343   :  { %1775 = vrcp.f32 %v1060_v26  ;;  %1354 = vmatpush.msra.mxu2 %v1284_v45 }
 0x344   :  { %1777 = vrcp.f32 %v1069_v18  ;;  %v1792_v18 = vld [vmem:[%s2572_s26 + $0x8] sm:$0xff] }
 0x348   :  { %v1774_v28 = vpop.eup %1773  ;;  %v1072_v30 = vpop.xlane.xlu0 %1071 }
 0x349   :  { %v1776_v29 = vpop.eup %1775  ;;  %v1096_v27 = vmul.f32 %v1774_v28, %v1760_v2  ;;  %v1081_v33 = vpop.xlane.xlu2 %1080  ;;  %1779 = vrcp.f32 %v1072_v30 }
 0x34a   :  { %v1778_v31 = vpop.eup %1777  ;;  %v1090_v32 = vmul.f32 %v1776_v29, %v1758_v63  ;;  %v1063_v34 = vpop.xlane.xlu1 %1062  ;;  %1781 = vrcp.f32 %v1081_v33 }
 0x34b   :  { %v1093_v35 = vmul.f32 %v1778_v31, %v1762_v5  ;;  %1702 = vmatmul.msk.f32.vlgmr.msrb.gmra.mxu2 %vm801_vm8, %v1096_v27  ;;  %1783 = vrcp.f32 %v1063_v34 }
 0x34c   :  { %1696 = vmatmul.msk.f32.vlgmr.msra.gmra.mxu0 %vm801_vm8, %v1090_v32  ;;  %1446 = vmatpush.msrb.mxu2 %v1288_v48  ;;  %v1604_v48 = vld [vmem:[%s2566_s15 + $0x68] sm:$0xff] }
 0x34d   :  { %1699 = vmatmul.msk.f32.vlgmr.msrb.gmra.mxu3 %vm801_vm8, %v1093_v35  ;;  %1308 = vmatpush.msra.mxu0 %v1282_v46  ;;  %v1606_v46 = vld [vmem:[%s2566_s15 + $0x78] sm:$0xff] }
 0x34e   :  { %1377 = vmatpush.msrb.mxu3 %v1285_v47  ;;  %v1605_v47 = vld [vmem:[%s2566_s15 + $0x70] sm:$0xff] }
 0x34f   :  { %v1780_v36 = vpop.eup %1779 }
 0x350   :  { %v1782_v37 = vpop.eup %1781  ;;  %v1094_v38 = vmul.f32 %v1780_v36, %v1764_v11 }
 0x351   :  { %v1784_v39 = vpop.eup %1783  ;;  %v1097_v40 = vmul.f32 %v1782_v37, %v1768_v13 }
 0x352   :  { %v1075_v41 = vpop.xlane.xlu1 %1074  ;;  %v1091_v42 = vmul.f32 %v1784_v39, %v1766_v15  ;;  %v1555_v39 = vld [vmem:[%s2564_s13 + $0x18] sm:$0xff] }
 0x353   :  { %1785 = vrcp.f32 %v1075_v41  ;;  %v1553_v41 = vld [vmem:[%s2564_s13 + $0x8] sm:$0xff] }
 0x354   :  { %1700 = vmatmul.msk.f32.vlgmr.msrb.gmra.mxu0 %vm801_vm8, %v1094_v38  ;;  %1697 = vmatmul.msk.f32.vlgmr.msrb.gmra.mxu1 %vm801_vm8, %v1091_v42  ;;  %v1552_v42 = vld [vmem:[%s2564_s13] sm:$0xff] }
 0x355   :  { %1703 = vmatmul.msk.f32.vlgmr.msra.gmra.mxu3 %vm801_vm8, %v1097_v40  ;;  %1331 = vmatpush.msrb.mxu1 %v1283_v49  ;;  %v1554_v40 = vld [vmem:[%s2564_s13 + $0x10] sm:$0xff] }
 0x356   :  { %1400 = vmatpush.msrb.mxu0 %v1286_v50  ;;  %1469 = vmatpush.msra.mxu3 %v1289_v51  ;;  %v1603_v51 = vld [vmem:[%s2566_s15 + $0x60] sm:$0xff] }
 0x359   :  { %v1786_v43 = vpop.eup %1785 }
 0x35a   :  { %v1095_v44 = vmul.f32 %v1786_v43, %v1770_v21 }
 0x35c   :  { %1701 = vmatmul.msk.f32.vlgmr.msra.gmra.mxu1 %vm801_vm8, %v1095_v44 }
 0x35d   :  { %1423 = vmatpush.msra.mxu1 %v1287_v52 }
 0x3c5   :  { %v1164_v53 = vpop.f32.mrf.mxu2 }
 0x3c6   :  { %1706 = vmatmul.msk.f32.vlgmr.msra.gmra.mxu2 %vm801_vm8, %v1164_v53 }
 0x3c9   :  { %v1118_v54 = vpop.f32.mrf.mxu0 }
 0x3ca   :  { %1704 = vmatmul.msk.f32.vlgmr.msra.gmra.mxu0 %vm801_vm8, %v1118_v54  ;;  %v1602_v54 = vld [vmem:[%s2566_s15 + $0x58] sm:$0xff] }
 0x3cb   :  { %1578 = vmatpush.msra.mxu0 %v1555_v39 }
 0x3cd   :  { %1579 = vmatpush.msra.mxu0 %v1554_v40 }
 0x3ce   :  { %v1256_v55 = vpop.f32.mrf.mxu2 }
 0x3cf   :  { %1710 = vmatmul.msk.f32.vlgmr.msrb.gmra.mxu2 %vm801_vm8, %v1256_v55  ;;  %1580 = vmatpush.msra.mxu0 %v1553_v41 }
 0x3d0   :  { %v1187_v56 = vpop.f32.mrf.mxu3 }
 0x3d1   :  { %1707 = vmatmul.msk.f32.vlgmr.msrb.gmra.mxu3 %vm801_vm8, %v1187_v56  ;;  %v1210_v57 = vpop.f32.mrf.mxu0  ;;  %v1141_v58 = vpop.f32.mrf.mxu1  ;;  %1581 = vmatpush.msra.mxu0 %v1552_v42  ;;  %v1601_v56 = vld [vmem:[%s2566_s15 + $0x50] sm:$0xff] }
 0x3d2   :  { %1708 = vmatmul.msk.f32.vlgmr.msrb.gmra.mxu0 %vm801_vm8, %v1210_v57  ;;  %1705 = vmatmul.msk.f32.vlgmr.msrb.gmra.mxu1 %vm801_vm8, %v1141_v58 }
 0x3d3   :  { %1611 = vmatpush.msrb.mxu1 %v1606_v46 }
 0x3d5   :  { %1612 = vmatpush.msrb.mxu1 %v1605_v47 }
 0x3d7   :  { %1613 = vmatpush.msrb.mxu1 %v1604_v48 }
 0x3d8   :  { %v1279_v59 = vpop.f32.mrf.mxu3 }
 0x3d9   :  { %1711 = vmatmul.msk.f32.vlgmr.msra.gmra.mxu3 %vm801_vm8, %v1279_v59  ;;  %v1233_v60 = vpop.f32.mrf.mxu1  ;;  %1614 = vmatpush.msrb.mxu1 %v1603_v51  ;;  %v1599_v59 = vld [vmem:[%s2566_s15 + $0x40] sm:$0xff] }
 0x3da   :  { %1709 = vmatmul.msk.f32.vlgmr.msra.gmra.mxu1 %vm801_vm8, %v1233_v60 }
 0x3db   :  { %1615 = vmatpush.msrb.mxu1 %v1602_v54 }
 0x3dd   :  { %1616 = vmatpush.msrb.mxu1 %v1601_v56 }
 0x447   :  { %v1310_v61 = vpop.f32.mrf.mxu0 }
 0x448   :  { %v1474_v0 = vsel %vm59_vm0, %v1310_v61, 0.0 }
 0x449   :  { %v1356_v62 = vpop.f32.mrf.mxu2 }
 0x44a   :  { %v1477_v3 = vsel %vm59_vm0, %v1356_v62, 0.0  ;;  %v1598_v62 = vld [vmem:[%s2566_s15 + $0x38] sm:$0xff] }
 0x44f   :  { %v1333_v63 = vpop.f32.mrf.mxu1  ;;  %v1402_v8 = vpop.f32.mrf.mxu0 }
 0x450   :  { %v1475_v1 = vsel %vm59_vm0, %v1333_v63, 0.0  ;;  %v1481_v16 = vsel %vm59_vm0, %v1402_v8, 0.0 }
 0x451   :  { %v1476_v2 = vadd.f32 %v1475_v1, %v1474_v0  ;;  %v1745_v1 = vld [vmem:[%s2562_s11] ss:$0 sm:$0xff] }
 0x452   :  { %v1448_v14 = vpop.f32.mrf.mxu2 }
 0x453   :  { %v1478_v5 = vadd.f32 %v1477_v3, %v1476_v2  ;;  %v1484_v21 = vsel %vm59_vm0, %v1448_v14, 0.0  ;;  %v1597_v2 = vld [vmem:[%s2566_s15 + $0x30] sm:$0xff] }
 0x454   :  { %v1379_v4 = vpop.f32.mrf.mxu3 }
 0x455   :  { %v1479_v7 = vsel %vm59_vm0, %v1379_v4, 0.0 }
 0x456   :  { %v1480_v9 = vadd.f32 %v1479_v7, %v1478_v5  ;;  %v1596_v7 = vld [vmem:[%s2566_s15 + $0x28] sm:$0xff] }
 0x457   :  { %v1425_v15 = vpop.f32.mrf.mxu1 }
 0x458   :  { %v1492_v11 = vadd.f32 %v1744_v6, %v1480_v9  ;;  %v1482_v13 = vsel %vm59_vm0, %v1425_v15, 0.0 }
 0x459   :  { %v1483_v17 = vadd.f32 %v1482_v13, %v1481_v16  ;;  %v1594_v16 = vld [vmem:[%s2566_s15 + $0x18] sm:$0xff] }
 0x45a   :  { %v2444_v20 = vadd.f32 %v1791_v19, %v1492_v11  ;;  %v1595_v11 = vld [vmem:[%s2566_s15 + $0x20] sm:$0xff] }
 0x45b   :  { %v1485_v23 = vadd.f32 %v1484_v21, %v1483_v17 }
 0x45c   :  { %v1471_v22 = vpop.f32.mrf.mxu3  ;;  %v1496_v24 = vsel %vm59_vm0, %v2444_v20, 0.0 }
 0x45d   :  { %v1486_v12 = vsel %vm59_vm0, %v1471_v22, 0.0  ;;  %1497 = vadd.xlane.f32.xlu2 %v1496_v24  ;;  %v1592_v24 = vld [vmem:[%s2566_s15 + $0x8] sm:$0xff] }
 0x45e   :  { %v1487_v25 = vadd.f32 %v1486_v12, %v1485_v23  ;;  %v1593_v23 = vld [vmem:[%s2566_s15 + $0x10] sm:$0xff]  ;;  %v1591_v12 = vld [vmem:[%s2566_s15] sm:$0xff] }
 0x460   :  { %v1493_v26 = vadd.f32 %v1744_v6, %v1487_v25  ;;  %v1746_v6 = vld [vmem:[%s2563_s12] ss:$0 sm:$0xff] }
 0x461   :  { %v1747_v25 = vld [vmem:[%s2565_s14] ss:$0 sm:$0xff] }
 0x462   :  { %v2453_v28 = vadd.f32 %v1792_v18, %v1493_v26 }
 0x464   :  { %v1499_v29 = vsel %vm59_vm0, %v2453_v28, 0.0 }
 0x465   :  { %1500 = vadd.xlane.f32.xlu0 %v1499_v29 }
 0x4d0   :  { %v1498_v27 = vpop.xlane.xlu2 %1497 }
 0x4d1   :  { %v1502_v30 = vmul.f32 %v1498_v27, %v1921_v10 }
 0x4d3   :  { %v1504_v31 = vsub.f32 %v2444_v20, %v1502_v30 }
 0x4d5   :  { %v1506_v32 = vmul.f32 %v1504_v31, %v1504_v31 }
 0x4d7   :  { %v1508_v33 = vsel %vm59_vm0, %v1506_v32, 0.0  ;;  %v1748_v32 = vld [vmem:[%s2567_s16] ss:$0 sm:$0xff]  ;;  %s1821_s16 = smov 128  }
 0x4d8   :  { %1509 = vadd.xlane.f32.xlu1 %v1508_v33  ;;  %v1501_v34 = vpop.xlane.xlu0 %1500 }
 0x4d9   :  { %v1503_v35 = vmul.f32 %v1501_v34, %v1921_v10 }
 0x4db   :  { %v2462_v36 = vsub.f32 %v2453_v28, %v1503_v35 }
 0x4dd   :  { %v1507_v37 = vmul.f32 %v2462_v36, %v2462_v36 }
 0x4df   :  { %v1511_v38 = vsel %vm59_vm0, %v1507_v37, 0.0 }
 0x4e0   :  { %1512 = vadd.xlane.f32.xlu2 %v1511_v38 }
 0x54b   :  { %v1510_v43 = vpop.xlane.xlu1 %1509 }
 0x54c   :  { %v1514_v44 = vmul.f32 %v1510_v43, %v1921_v10 }
 0x54e   :  { %v1516_v45 = vadd.f32 1e-05, %v1514_v44 }
 0x550   :  { %1787 = vrsqrt.f32 %v1516_v45  ;;  %vm1524_vm10 = vweird.f32 %v1516_v45 }
 0x553   :  { %v1513_v49 = vpop.xlane.xlu2 %1512 }
 0x554   :  { %v1515_v50 = vmul.f32 %v1513_v49, %v1921_v10  ;;  %v1600_v10 = vld [vmem:[%s2566_s15 + $0x48] sm:$0xff]  ;;  %s1820_s15 = smov [#allocation2]  }
 0x555   :  { %1617 = vmatpush.msrb.mxu1 %v1600_v10  ;;  %s1642_s14 = sshll.u32 %s1820_s15, 4  ;;  %s1643_s14 = int_to_ptr.vmem [resolvable:$true] %s1642_s14 }
 0x556   :  { %v1788_v52 = vpop.eup %1787  ;;  %v1517_v53 = vadd.f32 1e-05, %v1515_v50 }
 0x557   :  { %v1519_v55 = vmul.f32 %v1788_v52, %v1516_v45  ;;  %vm1525_vm9 = vweird.f32 %v1788_v52  ;;  %1618 = vmatpush.msrb.mxu1 %v1599_v59 }
 0x558   :  { %1789 = vrsqrt.f32 %v1517_v53  ;;  %vm1526_vm11 = vmor %vm1524_vm10, %vm1525_vm9  ;;  %vm1534_vm13 = vweird.f32 %v1517_v53 }
 0x559   :  { %v1520_v57 = vmul.f32 %v1788_v52, %v1519_v55  ;;  %1619 = vmatpush.msrb.mxu1 %v1598_v62 }
 0x55b   :  { %v1521_v58 = vmul.f32 0.5, %v1520_v57  ;;  %1620 = vmatpush.msrb.mxu1 %v1597_v2 }
 0x55d   :  { %v1522_v60 = vsub.f32 1.5, %v1521_v58  ;;  %1621 = vmatpush.msrb.mxu1 %v1596_v7 }
 0x55e   :  { %v1790_v61 = vpop.eup %1789 }
 0x55f   :  { %v1523_v63 = vmul.f32 %v1788_v52, %v1522_v60  ;;  %v1529_v0 = vmul.f32 %v1790_v61, %v1517_v53  ;;  %vm1535_vm12 = vweird.f32 %v1790_v61  ;;  %1622 = vmatpush.msrb.mxu1 %v1595_v11 }
 0x560   :  { %vm1536_vm14 = vmor %vm1534_vm13, %vm1535_vm12 }
 0x561   :  { %v1527_v3 = vsel %vm1526_vm11, %v1788_v52, %v1523_v63  ;;  %v1530_v4 = vmul.f32 %v1790_v61, %v1529_v0  ;;  %1623 = vmatpush.msrb.mxu1 %v1594_v16 }
 0x562   :  { %v1538_v5 = vmul.f32 %v1527_v3, %v1504_v31 }
 0x563   :  { %v1531_v8 = vmul.f32 0.5, %v1530_v4  ;;  %1624 = vmatpush.msrb.mxu1 %v1593_v23 }
 0x564   :  { %v1544_v9 = vmul.f32 %v1745_v1, %v1538_v5 }
 0x565   :  { %v1532_v14 = vsub.f32 1.5, %v1531_v8  ;;  %1625 = vmatpush.msrb.mxu1 %v1592_v24 }
 0x566   :  { %v1550_v15 = vadd.f32 %v1746_v6, %v1544_v9 }
 0x567   :  { %v1533_v13 = vmul.f32 %v1790_v61, %v1532_v14  ;;  %1626 = vmatpush.msrb.mxu1 %v1591_v12 }
 0x568   :  { %1712 = vmatmul.msk.f32.vlgmr.msra.gmra.mxu0 %vm59_vm0, %v1550_v15 }
 0x569   :  { %v1537_v17 = vsel %vm1536_vm14, %v1790_v61, %v1533_v13 }
 0x56a   :  { %v1539_v19 = vmul.f32 %v1537_v17, %v2462_v36 }
 0x56c   :  { %v1545_v21 = vmul.f32 %v1745_v1, %v1539_v19 }
 0x56e   :  { %v1551_v22 = vadd.f32 %v1746_v6, %v1545_v21 }
 0x570   :  { %1713 = vmatmul.msk.f32.gmra.mxu0 %vm59_vm0, %v1551_v22 }
 0x5e5   :  { %v1583_v26 = vpop.f32.mrf.mxu0 }
 0x5e6   :  { %v1584_v18 = vadd.f32 %v1747_v25, %v1583_v26 }
 0x5e8   :  { %v1589_v29 = vmax.f32 %v1584_v18, 0.0 }
 0x5ea   :  { %1627 = vmatmul.f32.vlgmr.msrb.gmra.mxu1 %v1589_v29 }
 0x5ed   :  { %v1586_v27 = vpop.f32.mrf.mxu0 }
 0x5ee   :  { %v1587_v30 = vadd.f32 %v1747_v25, %v1586_v27 }
 0x5f0   :  { %v1590_v31 = vmax.f32 %v1587_v30, 0.0 }
 0x5f2   :  { %1630 = vmatmul.f32.gmra.mxu1 %v1590_v31 }
 0x667   :  { %v1628_v33 = vpop.f32.mrf.mxu1 }
 0x668   :  { %v1629_v34 = vadd.f32 %v1748_v32, %v1628_v33 }
 0x66a   :  { %v1634_v35 = vadd.f32 %v1629_v34, %v2444_v20 }
 0x66c   :  { %1636 = vst.msk [vmem:[#allocation2] sm:$0xff] %vm59_vm0, %v1634_v35 }
 0x66f   :  { %v1631_v36 = vpop.f32.mrf.mxu1 }
 0x670   :  { %v1632_v37 = vadd.f32 %v1748_v32, %v1631_v36 }
 0x672   :  { %v1635_v38 = vadd.f32 %v1632_v37, %v2453_v28 }
 0x674   :  { %1637 = vst.msk [vmem:[#allocation2 + $0x8] sm:$0xff] %vm59_vm0, %v1635_v38 }
 0x675   :  { %1650 = dma.vmem_to_hbm [thread:$0]  %s1643_s14, 256, %s1645_s10, [#allocation3], %s1821_s16, %s1821_s16, %s1822_s4  }
 0x676   :  { %1817 = dma.done.wait [#allocation3], 256  }
 0x677   :  { %1818 = vsyncadd [#allocation3], 4294967040 }
 0x678   :  { %1655 = vsyncpa [#allocation3], 1 }

</bundles_post_ra>
